<compile_context>
chip_gen: v7x
topology: tpu7x:2x2x1
jax: 0.10.0
libtpu: 0.0.40
codegen_flags: <defaults>
</compile_context>

<pallas_src>
import jax
import jax.numpy as jnp
from jax.experimental import pallas as pl
from jax.experimental.pallas import tpu as pltpu


def position_conv_kernel(x_ref, m_ref, o_ref):
    # x_ref: (tb, K+1)  -- flat x rows augmented with a constant ones column
    # m_ref: (K+1, W)   -- scatter matrix with the bias folded in as the last row
    # o_ref: (tb, W)    -- lane-dense output block
    o_ref[...] = jnp.dot(
        x_ref[...], m_ref[...], preferred_element_type=jnp.float32
    ).astype(o_ref.dtype)


def _cdiv(a, b):
    return (a + b - 1) // b


def _round_up(a, b):
    return _cdiv(a, b) * b


def position_conv_forward(
    x,
    weight,
    bias,
    *,
    nf,
    nx,
    n_var=3,
    out_dtype=None,            # pass jnp.bfloat16 to halve writeback bytes (if consumer tolerates it)
    mxu_dtype=jnp.bfloat16,    # MXU operand dtype; None / jnp.float32 for exact-f32 operands
    target_tile_bytes=None,    # optional cap on per-step output-tile bytes
    min_grid_steps=4,          # keep >= this many grid steps when possible (v7x megacore)
):
    """Pallas implementation of position_conv.forward (n_var == 3 path)."""
    assert n_var % 3 == 0, "'n_var' must be divisible by 3"
    if n_var > 3:
        # TODO(synk): n_var > 3 pair-sum (split/sum/cat) branch not implemented.
        raise NotImplementedError("n_var > 3 branch not implemented")

    if out_dtype is None:
        out_dtype = x.dtype
    if mxu_dtype is None:
        mxu_dtype = jnp.float32

    size_out = x.shape[:-1] + (nf * nx * 3,)
    K = n_var * nx               # contraction width of the original op (48 default)
    Kp = K + 1                   # + constant ones column (bias folded into the matmul)
    W = n_var * nf * nx          # lane-dense output width per row

    # --- Flatten x, append the ones column, cast to the MXU operand dtype ---
    xr = x.reshape(-1, K)
    B = xr.shape[0]
    xr = jnp.pad(xr, ((0, 0), (0, 1)), constant_values=1.0).astype(mxu_dtype)

    # --- Precompute the scatter matrix (with bias row), tiny constant ---
    # M[v*nx + i, v*nf*nx + j*nx + i] = weight[v, 0, j];  M[K, v*nf*nx + j*nx + i] = bias[j]
    w2 = weight.reshape(n_var, nf).astype(jnp.float32)
    eye_v = jnp.eye(n_var, dtype=jnp.float32)
    eye_x = jnp.eye(nx, dtype=jnp.float32)
    m = jnp.einsum("vu,vj,ik->viujk", eye_v, w2, eye_x).reshape(K, W)
    b_row = jnp.broadcast_to(
        bias.astype(jnp.float32)[None, :, None], (n_var, nf, nx)
    ).reshape(1, W)
    m_aug = jnp.concatenate([m, b_row], axis=0).astype(mxu_dtype)

    in_isz = jnp.dtype(mxu_dtype).itemsize
    out_isz = jnp.dtype(out_dtype).itemsize
    # Align batch tiles to the native sublane pack of both the kernel input and
    # output dtypes (8 rows for 4-byte, 16 for 2-byte, 32 for 1-byte).
    align = max(8, 32 // out_isz, 32 // in_isz)

    # --- Generation-aware VMEM budget and batch-tile selection ---
    try:
        info = pltpu.get_tpu_info()
        vmem_cap = int(getattr(info, "vmem_capacity_bytes", 64 << 20))
    except Exception:
        vmem_cap = 64 << 20      # conservative (v7x-sized) fallback
    vmem_budget = (vmem_cap * 3) // 4            # ~96 MiB on v5e/v6e, ~48 MiB on v7x
    headroom = 4 << 20
    const_bytes = 2 * Kp * W * in_isz            # (double-buffered) resident scatter matrix
    # Per-batch-row VMEM cost: double-buffered input + output tiles plus one
    # f32 matmul-result row (conservatively assume Mosaic materializes it).
    per_row = 2 * Kp * in_isz + 2 * W * out_isz + W * 4
    tb_cap = max(align, ((vmem_budget - const_bytes - headroom) // per_row) // align * align)
    if target_tile_bytes is not None:
        tb_cap = min(
            tb_cap,
            max(align, (int(target_tile_bytes) // (W * out_isz)) // align * align),
        )
    # Prefer >= min_grid_steps grid steps so the batch axis can shard across cores.
    tb_pref = max(align, _round_up(_cdiv(max(B, 1), min_grid_steps), align))
    tb = min(tb_cap, tb_pref)
    num_steps = _cdiv(max(B, 1), tb)             # ragged last block handled by Pallas masking

    vmem_limit = int(max(min(vmem_budget, vmem_cap), 32 << 20))

    cost = pl.CostEstimate(
        flops=2 * B * Kp * W,
        transcendentals=0,
        bytes_accessed=int(B * Kp * in_isz + B * W * out_isz + Kp * W * in_isz),
    )

    out = pl.pallas_call(
        position_conv_kernel,
        out_shape=jax.ShapeDtypeStruct((B, W), out_dtype),
        grid_spec=pl.GridSpec(
            grid=(num_steps,),
            in_specs=[
                pl.BlockSpec((tb, Kp), lambda b: (b, 0)),
                pl.BlockSpec((Kp, W), lambda b: (0, 0)),   # resident scatter matrix (+bias row)
            ],
            out_specs=pl.BlockSpec((tb, W), lambda b: (b, 0)),
        ),
        compiler_params=pltpu.CompilerParams(
            dimension_semantics=("parallel",),
            vmem_limit_bytes=vmem_limit,
        ),
        cost_estimate=cost,
    )(xr, m_aug)

    return out.reshape(size_out)


def position_conv_reference(x, weight, bias, *, nf, nx, n_var=3):
    """Pure-JAX transcription of the PyTorch forward (n_var == 3)."""
    size_out = x.shape[:-1] + (nf * nx * 3,)
    xr = x.reshape(-1, n_var, nx, 1)
    y = jnp.matmul(xr, weight) + bias                # (B, n_var, nx, nf)
    y = jnp.swapaxes(y, -1, -2)                      # (B, n_var, nf, nx)
    return y.reshape(size_out)


if __name__ == "__main__":
    nf, nx, n_var = 32, 16, 3
    batch, seq = 2, 8

    key = jax.random.PRNGKey(0)
    kx, kw, kb = jax.random.split(key, 3)
    # Module __init__ uses zeros; random values make the correctness check meaningful.
    x = jax.random.normal(kx, (batch, seq, n_var * nx), dtype=jnp.float32)
    weight = jax.random.normal(kw, (n_var, 1, nf), dtype=jnp.float32)
    bias = jax.random.normal(kb, (nf,), dtype=jnp.float32)

    # Default (bf16 MXU operand) path.
    out = position_conv_forward(x, weight, bias, nf=nf, nx=nx, n_var=n_var)
    out = jax.block_until_ready(out)
    assert out.shape == (batch, seq, nf * nx * 3), out.shape

    # Tight check against a reference fed the same bf16-rounded operands the MXU
    # sees (M has one nonzero per column, so accumulation itself is exact).
    bf = lambda a: a.astype(jnp.bfloat16).astype(jnp.float32)
    ref_rounded = position_conv_reference(bf(x), bf(weight), bf(bias), nf=nf, nx=nx, n_var=n_var)
    assert jnp.allclose(out.astype(jnp.float32), ref_rounded, atol=1e-4, rtol=1e-4), \
        "mismatch vs bf16-rounded reference"

    # Loose sanity check against the exact-f32 reference (~1e-3 rel bf16 rounding).
    ref = position_conv_reference(x, weight, bias, nf=nf, nx=nx, n_var=n_var)
    assert jnp.allclose(out.astype(jnp.float32), ref, atol=1e-1, rtol=5e-2), \
        "mismatch vs f32 reference"

    # Exact-operand (f32 MXU) path for strict-precision consumers.
    out_f32 = position_conv_forward(
        x, weight, bias, nf=nf, nx=nx, n_var=n_var, mxu_dtype=jnp.float32
    )
    out_f32 = jax.block_until_ready(out_f32)
    assert jnp.allclose(out_f32, ref, atol=1e-3, rtol=1e-3), "mismatch vs reference (f32 path)"

    print("KERNEL_OK")
</pallas_src>

<mosaic_0001>
module attributes {stable_mosaic.version = 11 : i64} {
  func.func @position_conv_kernel(%arg0: i32, %arg1: memref<16x49xbf16, #tpu.memory_space<vmem>>, %arg2: memref<49x1536xbf16, #tpu.memory_space<vmem>>, %arg3: memref<16x1536xf32, #tpu.memory_space<vmem>>) attributes {dimension_semantics = [#tpu.dimension_semantics<parallel>], iteration_bounds = array<i64: 1>, scalar_prefetch = 0 : i64, scratch_operands = 0 : i64, tpu.core_type = #tpu.core_type<tc>, window_params = [{transform_indices = @transform_0, window_bounds = array<i64: 16, 49>}, {pipeline_mode = #tpu.pipeline_mode<synchronous>, transform_indices = @transform_1, window_bounds = array<i64: 49, 1536>}, {transform_indices = @transform_2, window_bounds = array<i64: 16, 1536>}]} {
    %c0 = arith.constant 0 : index
    %c0_0 = arith.constant 0 : index
    %0 = vector.load %arg1[%c0, %c0_0] : memref<16x49xbf16, #tpu.memory_space<vmem>>, vector<16x49xbf16>
    %c0_1 = arith.constant 0 : index
    %c0_2 = arith.constant 0 : index
    %1 = vector.load %arg2[%c0_1, %c0_2] : memref<49x1536xbf16, #tpu.memory_space<vmem>>, vector<49x1536xbf16>
    %cst = arith.constant dense<0.000000e+00> : vector<16x1536xf32>
    %2 = tpu.matmul %0, %1, %cst {dimension_numbers = #tpu.dot_dimension_numbers<[1], [0], [0], [1], [0, 0, 1, 1], [], []>} : vector<16x49xbf16>, vector<49x1536xbf16>, vector<16x1536xf32> -> vector<16x1536xf32>
    %c0_3 = arith.constant 0 : index
    %c0_4 = arith.constant 0 : index
    %3 = vector.load %arg3[%c0_3, %c0_4] : memref<16x1536xf32, #tpu.memory_space<vmem>>, vector<16x1536xf32>
    tpu.vector_store %arg3[%c0_3, %c0_4], %2 {strides = array<i32>} : memref<16x1536xf32, #tpu.memory_space<vmem>>, vector<16x1536xf32>,
    return
  }
  func.func @transform_0(%arg0: i32) -> (i32, i32) {
    %c0_i32 = arith.constant 0 : i32
    %c0_i32_0 = arith.constant 0 : i32
    return %arg0, %c0_i32 : i32, i32
  }
  func.func @transform_1(%arg0: i32) -> (i32, i32) {
    %c0_i32 = arith.constant 0 : i32
    %c0_i32_0 = arith.constant 0 : i32
    %c0_i32_1 = arith.constant 0 : i32
    return %c0_i32, %c0_i32_0 : i32, i32
  }
  func.func @transform_2(%arg0: i32) -> (i32, i32) {
    %c0_i32 = arith.constant 0 : i32
    %c0_i32_0 = arith.constant 0 : i32
    return %arg0, %c0_i32 : i32, i32
  }
}

</mosaic_0001>

<bundles_post_ra>
// kernel: tpu_custom_call.1
= control target key start
LH: loop header
LB: loop body
LE: loop exit
PB: predicated region body
PF: predicated region fallthrough
CT: control target
= control target key end

     0   :  { %7 = vsyncpa [#allocation3], 0  ;;  %s943_s0 = inlined_call_operand.hbm [shape: bf16[16,49], index: 0, kind: input, shape index: {}]   ;;  %s944_s1 = inlined_call_operand.hbm [shape: bf16[49,1536], index: 1, kind: input, shape index: {}]   ;;  %s945_s2 = inlined_call_operand.hbm [shape: f32[16,1536], index: 2, kind: output, shape index: {}]  }
   0x1   :  { %8 = vsyncpa [#allocation6], 0 }
   0x2   :  { %9 = vsyncpa [#allocation4], 0  ;;  %s847_s9 = smov [#allocation2]   ;;  %s775_s13 = scalar_lea.hbm %s943_s0, 128 }
   0x3   :  { %s15_s10 = sshll.u32 %s847_s9, 4  ;;  %p776_p0 = scmp.ne.s32.totalorder %s943_s0, %s775_s13  ;;  %s16_s10 = int_to_ptr.vmem [resolvable:$true] %s15_s10 }
   0x4   :  { %p779_p1 = scmp.lt.u32.totalorder %s775_s13, %s943_s0 }
   0x6   :  { %p781_p2 = pnand %p779_p1, %p776_p0 }
   0x8   :  { %784 = shalt.err (!%p781_p2)
}
   0x9   :  { %s785_s18 = scalar_lea.vmem %s16_s10, 128  ;;  %p790_p4 = scmp.lt.s32.totalorder %s16_s10, %s16_s10 }
   0xa   :  { %p786_p3 = scmp.ne.s32.totalorder %s16_s10, %s785_s18  ;;  %p791_p5 = scmp.lt.s32.totalorder %s785_s18, %s785_s18 }
   0xc   :  { %p792_p6 = por %p791_p5, %p790_p4 }
   0xe   :  { %p793_p7 = pnand %p792_p6, %p786_p3 }
  0x10   :  { %796 = shalt.err (!%p793_p7)
}
  0x11   :  { %s848_s19 = smov 64   ;;  %s849_s20 = smov 4  }
  0x12   :  { %21 = dma.hbm_to_vmem [thread:$0]  %s943_s0, 128, %s16_s10, [#allocation3], %s848_s19, %s848_s19, %s849_s20  }
  0x13   :  { %s850_s23 = smov [#allocation5]   ;;  %s797_s27 = scalar_lea.hbm %s944_s1, 5376 }
  0x14   :  { %s27_s24 = sshll.u32 %s850_s23, 4  ;;  %p798_p8 = scmp.ne.s32.totalorder %s944_s1, %s797_s27  ;;  %s28_s24 = int_to_ptr.vmem [resolvable:$true] %s27_s24 }
  0x15   :  { %p801_p9 = scmp.lt.u32.totalorder %s797_s27, %s944_s1 }
  0x17   :  { %p803_p10 = pnand %p801_p9, %p798_p8 }
  0x19   :  { %806 = shalt.err (!%p803_p10)
}
  0x1a   :  { %s807_s4 = scalar_lea.vmem %s28_s24, 5376  ;;  %p812_p12 = scmp.lt.s32.totalorder %s28_s24, %s28_s24 }
  0x1b   :  { %p808_p11 = scmp.ne.s32.totalorder %s28_s24, %s807_s4  ;;  %p813_p13 = scmp.lt.s32.totalorder %s807_s4, %s807_s4 }
  0x1d   :  { %p814_p0 = por %p813_p13, %p812_p12 }
  0x1f   :  { %p815_p1 = pnand %p814_p0, %p808_p11 }
  0x21   :  { %818 = shalt.err (!%p815_p1)
}
  0x22   :  { %s851_s0 = smov 768   ;;  %s852_s5 = smov 48  }
  0x23   :  { %33 = dma.hbm_to_vmem [thread:$0]  %s944_s1, 5376, %s28_s24, [#allocation6], %s851_s0, %s851_s0, %s852_s5  }
  0x24   :  { %841 = dma.done.wait [#allocation3], 128  }
  0x25   :  { %842 = vsyncadd [#allocation3], 4294967168 }
  0x26   :  { %843 = dma.done.wait [#allocation6], 5376  }
  0x27   :  { %844 = vsyncadd [#allocation6], 4294961920  ;;  %v853_v0 = vmov 0   ;;  %v708_v1 = vld [vmem:[#allocation5 + $0x4] ss:$48 sps:$4 sm:$0xff]   ;;  %vm304_vm0 = vcmask 1040384  }
  0x28   :  { %375 = vmatprep.mubr.bf16.mxu0 %v853_v0  ;;  %418 = vmatprep.mubr.bf16.mxu1 %v853_v0  ;;  %v710_v2 = vld [vmem:[#allocation5 + $0xc] ss:$48 sps:$4 sm:$0xff]   ;;  %v712_v3 = vld [vmem:[#allocation5] ss:$48 sps:$4 sm:$0xff]   ;;  %v713_v4 = vld [vmem:[#allocation5 + $0x8] ss:$48 sps:$4 sm:$0xff]  }
  0x29   :  { %343 = vmatprep.subr.bf16.mxu0 %v708_v1  ;;  %386 = vmatprep.subr.bf16.mxu1 %v710_v2  ;;  %v714_v5 = vld [vmem:[#allocation5 + $0x64] ss:$48 sps:$4 sm:$0xff]   ;;  %v716_v6 = vld [vmem:[#allocation5 + $0x6c] ss:$48 sps:$4 sm:$0xff]   ;;  %v718_v7 = vld [vmem:[#allocation5 + $0x60] ss:$48 sps:$4 sm:$0xff]  }
  0x2a   :  { %344 = vmatpush1.bf16.msra.mxu0 %v712_v3  ;;  %387 = vmatpush1.bf16.msra.mxu1 %v713_v4  ;;  %v719_v8 = vld [vmem:[#allocation5 + $0x68] ss:$48 sps:$4 sm:$0xff]   ;;  %v720_v9 = vld [vmem:[#allocation5 + $0xc4] ss:$48 sps:$4 sm:$0xff]   ;;  %v899_v10 = vsel %vm304_vm0, 65535, %v853_v0  ;;  %vm300_vm1 = vcmask 400384  }
  0x2b   :  { %345 = vmatprep.subr.bf16.mxu0 %v714_v5  ;;  %388 = vmatprep.subr.bf16.mxu1 %v716_v6  ;;  %v722_v11 = vld [vmem:[#allocation5 + $0xcc] ss:$48 sps:$4 sm:$0xff]   ;;  %v724_v12 = vld [vmem:[#allocation5 + $0xc0] ss:$48 sps:$4 sm:$0xff]   ;;  %v725_v13 = vld [vmem:[#allocation5 + $0xc8] ss:$48 sps:$4 sm:$0xff]  }
  0x2c   :  { %v79_v14 = vld [vmem:[#allocation5 + $0x120] sm:$0x11]  ;;  %v80_v15 = vld [vmem:[#allocation5 + $0x128] sm:$0x11]  ;;  %v905_v26 = vld [vmem:[#allocation2] sm:$0xff]   ;;  %s854_s1 = smov [#allocation7]  }
  0x2d   :  { %v681_v16 = vcombine.high %v79_v14, %v79_v14  ;;  %v683_v17 = vcombine.high %v80_v15, %v80_v15  ;;  %v680_v18 = vcombine.low %v79_v14, %v79_v14  ;;  %v682_v19 = vcombine.low %v80_v15, %v80_v15  ;;  %v733_v24 = vld [vmem:[#allocation5 + $0x14] ss:$48 sps:$4 sm:$0xff]   ;;  %v736_v25 = vld [vmem:[#allocation5 + $0x1c] ss:$48 sps:$4 sm:$0xff]   ;;  %v731_v27 = vld [vmem:[#allocation5 + $0x10] ss:$48 sps:$4 sm:$0xff]  }
  0x2e   :  { %346 = vmatpush1.bf16.msra.mxu0 %v718_v7  ;;  %389 = vmatpush1.bf16.msra.mxu1 %v719_v8  ;;  %v734_v28 = vld [vmem:[#allocation5 + $0x18] ss:$48 sps:$4 sm:$0xff]   ;;  %v739_v29 = vld [vmem:[#allocation5 + $0x74] ss:$48 sps:$4 sm:$0xff]   ;;  %v742_v30 = vld [vmem:[#allocation5 + $0x7c] ss:$48 sps:$4 sm:$0xff]  }
  0x2f   :  { %347 = vmatprep.subr.bf16.mxu0 %v720_v9  ;;  %390 = vmatprep.subr.bf16.mxu1 %v722_v11  ;;  %v311_v20 = vand.u32 %v681_v16, %v899_v10  ;;  %v317_v21 = vand.u32 %v683_v17, %v899_v10  ;;  %v308_v22 = vand.u32 %v680_v18, %v899_v10  ;;  %v81_v31 = vld [vmem:[#allocation5 + $0x130] sm:$0x11]  ;;  %v82_v32 = vld [vmem:[#allocation5 + $0x138] sm:$0x11]  ;;  %v83_v53 = vld [vmem:[#allocation5 + $0x140] sm:$0x11] }
  0x30   :  { %v314_v23 = vand.u32 %v682_v19, %v899_v10  ;;  %v737_v33 = vld [vmem:[#allocation5 + $0x70] ss:$48 sps:$4 sm:$0xff]   ;;  %v740_v34 = vld [vmem:[#allocation5 + $0x78] ss:$48 sps:$4 sm:$0xff]   ;;  %v745_v35 = vld [vmem:[#allocation5 + $0xd4] ss:$48 sps:$4 sm:$0xff]   ;;  %v685_v37 = vcombine.high %v81_v31, %v81_v31  ;;  %v687_v38 = vcombine.high %v82_v32, %v82_v32  ;;  %v684_v41 = vcombine.low %v81_v31, %v81_v31 }
  0x31   :  { %v748_v36 = vld [vmem:[#allocation5 + $0xdc] ss:$48 sps:$4 sm:$0xff]   ;;  %v743_v39 = vld [vmem:[#allocation5 + $0xd0] ss:$48 sps:$4 sm:$0xff]   ;;  %v746_v40 = vld [vmem:[#allocation5 + $0xd8] ss:$48 sps:$4 sm:$0xff]   ;;  %v686_v42 = vcombine.low %v82_v32, %v82_v32  ;;  %v689_v59 = vcombine.high %v83_v53, %v83_v53  ;;  %v688_v63 = vcombine.low %v83_v53, %v83_v53 }
  0x32   :  { %348 = vmatpush1.bf16.msra.mxu0 %v724_v12  ;;  %391 = vmatpush1.bf16.msra.mxu1 %v725_v13  ;;  %v323_v43 = vand.u32 %v685_v37, %v899_v10  ;;  %v329_v44 = vand.u32 %v687_v38, %v899_v10  ;;  %v320_v45 = vand.u32 %v684_v41, %v899_v10  ;;  %v755_v47 = vld [vmem:[#allocation5 + $0x24] ss:$48 sps:$4 sm:$0xff]   ;;  %v758_v48 = vld [vmem:[#allocation5 + $0x2c] ss:$48 sps:$4 sm:$0xff]   ;;  %v753_v49 = vld [vmem:[#allocation5 + $0x20] ss:$48 sps:$4 sm:$0xff]  }
  0x33   :  { %349 = vmatprep.subr.bf16.mxu0 %v311_v20  ;;  %392 = vmatprep.subr.bf16.mxu1 %v317_v21  ;;  %v326_v46 = vand.u32 %v686_v42, %v899_v10  ;;  %v756_v50 = vld [vmem:[#allocation5 + $0x28] ss:$48 sps:$4 sm:$0xff]   ;;  %v761_v51 = vld [vmem:[#allocation5 + $0x84] ss:$48 sps:$4 sm:$0xff]   ;;  %v764_v52 = vld [vmem:[#allocation5 + $0x8c] ss:$48 sps:$4 sm:$0xff]   ;;  %v335_v2 = vand.u32 %v689_v59, %v899_v10  ;;  %v332_v4 = vand.u32 %v688_v63, %v899_v10 }
  0x34   :  { %v84_v54 = vld [vmem:[#allocation5 + $0x148] sm:$0x11]  ;;  %v759_v55 = vld [vmem:[#allocation5 + $0x80] ss:$48 sps:$4 sm:$0xff]   ;;  %v767_v57 = vld [vmem:[#allocation5 + $0xe4] ss:$48 sps:$4 sm:$0xff]  }
  0x35   :  { %v762_v56 = vld [vmem:[#allocation5 + $0x88] ss:$48 sps:$4 sm:$0xff]   ;;  %v770_v58 = vld [vmem:[#allocation5 + $0xec] ss:$48 sps:$4 sm:$0xff]   ;;  %v691_v60 = vcombine.high %v84_v54, %v84_v54  ;;  %v765_v61 = vld [vmem:[#allocation5 + $0xe0] ss:$48 sps:$4 sm:$0xff]   ;;  %v690_v1 = vcombine.low %v84_v54, %v84_v54 }
  0x36   :  { %350 = vmatpush1.bf16.msra.mxu0 %v308_v22  ;;  %393 = vmatpush1.bf16.msra.mxu1 %v314_v23  ;;  %v768_v62 = vld [vmem:[#allocation5 + $0xe8] ss:$48 sps:$4 sm:$0xff]   ;;  %s630_s8 = sshll.u32 %s854_s1, 4  ;;  %s631_s8 = int_to_ptr.vmem [resolvable:$true] %s630_s8 }
  0x37   :  { %429 = vmatprep.subr.bf16.mxu0 %v733_v24  ;;  %472 = vmatprep.subr.bf16.mxu1 %v736_v25  ;;  %v341_v3 = vand.u32 %v691_v60, %v899_v10  ;;  %v338_v5 = vand.u32 %v690_v1, %v899_v10  ;;  %s819_s9 = scalar_lea.vmem %s631_s8, 3072  ;;  %p824_p3 = scmp.lt.s32.totalorder %s631_s8, %s631_s8 }
  0x38   :  { %p820_p2 = scmp.ne.s32.totalorder %s631_s8, %s819_s9  ;;  %p825_p4 = scmp.lt.s32.totalorder %s819_s9, %s819_s9 }
  0x39   :  { %692 = vmatmul.mubr.msk.bf16.vlgmr.msra.gmra.mrb[0].mxu0 %vm300_vm1, %v905_v26  ;;  %693 = vmatmul.mubr.msk.bf16.vlgmr.msra.gmra.mrb[0].mxu1 %vm300_vm1, %v905_v26 }
  0x3a   :  { %430 = vmatpush1.bf16.msra.mxu0 %v731_v27  ;;  %473 = vmatpush1.bf16.msra.mxu1 %v734_v28  ;;  %p826_p5 = por %p825_p4, %p824_p3 }
  0x3b   :  { %431 = vmatprep.subr.bf16.mxu0 %v739_v29  ;;  %474 = vmatprep.subr.bf16.mxu1 %v742_v30 }
  0x3c   :  { %461 = vmatprep.mubr.bf16.mxu0 %v853_v0  ;;  %504 = vmatprep.mubr.bf16.mxu1 %v853_v0  ;;  %p827_p6 = pnand %p826_p5, %p820_p2 }
  0x3e   :  { %432 = vmatpush1.bf16.msra.mxu0 %v737_v33  ;;  %475 = vmatpush1.bf16.msra.mxu1 %v740_v34 }
  0x3f   :  { %433 = vmatprep.subr.bf16.mxu0 %v745_v35  ;;  %476 = vmatprep.subr.bf16.mxu1 %v748_v36 }
  0x42   :  { %434 = vmatpush1.bf16.msra.mxu0 %v743_v39  ;;  %477 = vmatpush1.bf16.msra.mxu1 %v746_v40 }
  0x43   :  { %435 = vmatprep.subr.bf16.mxu0 %v323_v43  ;;  %478 = vmatprep.subr.bf16.mxu1 %v329_v44 }
  0x46   :  { %436 = vmatpush1.bf16.msra.mxu0 %v320_v45  ;;  %479 = vmatpush1.bf16.msra.mxu1 %v326_v46 }
  0x47   :  { %515 = vmatprep.subr.bf16.mxu0 %v755_v47  ;;  %558 = vmatprep.subr.bf16.mxu1 %v758_v48 }
  0x49   :  { %694 = vmatmul.mubr.msk.bf16.vlgmr.msra.gmra.mrb[4].mxu0 %vm300_vm1, %v905_v26  ;;  %695 = vmatmul.mubr.msk.bf16.vlgmr.msra.gmra.mrb[4].mxu1 %vm300_vm1, %v905_v26 }
  0x4a   :  { %516 = vmatpush1.bf16.msra.mxu0 %v753_v49  ;;  %559 = vmatpush1.bf16.msra.mxu1 %v756_v50 }
  0x4b   :  { %517 = vmatprep.subr.bf16.mxu0 %v761_v51  ;;  %560 = vmatprep.subr.bf16.mxu1 %v764_v52 }
  0x4c   :  { %547 = vmatprep.mubr.bf16.mxu0 %v853_v0  ;;  %590 = vmatprep.mubr.bf16.mxu1 %v853_v0 }
  0x4e   :  { %518 = vmatpush1.bf16.msra.mxu0 %v759_v55  ;;  %561 = vmatpush1.bf16.msra.mxu1 %v762_v56 }
  0x4f   :  { %519 = vmatprep.subr.bf16.mxu0 %v767_v57  ;;  %562 = vmatprep.subr.bf16.mxu1 %v770_v58 }
  0x52   :  { %520 = vmatpush1.bf16.msra.mxu0 %v765_v61  ;;  %563 = vmatpush1.bf16.msra.mxu1 %v768_v62 }
  0x53   :  { %521 = vmatprep.subr.bf16.mxu0 %v335_v2  ;;  %564 = vmatprep.subr.bf16.mxu1 %v341_v3 }
  0x56   :  { %522 = vmatpush1.bf16.msra.mxu0 %v332_v4  ;;  %565 = vmatpush1.bf16.msra.mxu1 %v338_v5 }
  0x59   :  { %696 = vmatmul.mubr.msk.bf16.vlgmr.msra.gmra.mrb[8].mxu0 %vm300_vm1, %v905_v26  ;;  %697 = vmatmul.mubr.msk.bf16.vlgmr.msra.gmra.mrb[8].mxu1 %vm300_vm1, %v905_v26 }
 0x10c   :  { %v377_v0 = vpop.f32.mrb[0].mxu0  ;;  %v420_v6 = vpop.f32.mrb[0].mxu1 }
 0x10d   :  { %601 = vst [vmem:[#allocation7] sm:$0xff] %v377_v0  ;;  %603 = vst [vmem:[#allocation7 + $0x10] sm:$0xff] %v420_v6  ;;  %v379_v7 = vpop.f32.mrb[1].mxu0  ;;  %v422_v8 = vpop.f32.mrb[1].mxu1 }
 0x10e   :  { %602 = vst [vmem:[#allocation7 + $0x8] sm:$0xff] %v379_v7  ;;  %604 = vst [vmem:[#allocation7 + $0x18] sm:$0xff] %v422_v8  ;;  %v381_v9 = vpop.f32.mrb[2].mxu0  ;;  %v424_v10 = vpop.f32.mrb[2].mxu1 }
 0x10f   :  { %613 = vst [vmem:[#allocation7 + $0x60] sm:$0xff] %v381_v9  ;;  %615 = vst [vmem:[#allocation7 + $0x70] sm:$0xff] %v424_v10  ;;  %v383_v11 = vpop.f32.mrb[3].mxu0  ;;  %v426_v12 = vpop.f32.mrb[3].mxu1 }
 0x110   :  { %614 = vst [vmem:[#allocation7 + $0x68] sm:$0xff] %v383_v11  ;;  %616 = vst [vmem:[#allocation7 + $0x78] sm:$0xff] %v426_v12 }
 0x11c   :  { %v463_v13 = vpop.f32.mrb[4].mxu0  ;;  %v506_v14 = vpop.f32.mrb[4].mxu1 }
 0x11d   :  { %605 = vst [vmem:[#allocation7 + $0x20] sm:$0xff] %v463_v13  ;;  %607 = vst [vmem:[#allocation7 + $0x30] sm:$0xff] %v506_v14  ;;  %v465_v15 = vpop.f32.mrb[5].mxu0  ;;  %v508_v16 = vpop.f32.mrb[5].mxu1 }
 0x11e   :  { %606 = vst [vmem:[#allocation7 + $0x28] sm:$0xff] %v465_v15  ;;  %608 = vst [vmem:[#allocation7 + $0x38] sm:$0xff] %v508_v16  ;;  %v467_v17 = vpop.f32.mrb[6].mxu0  ;;  %v510_v18 = vpop.f32.mrb[6].mxu1 }
 0x11f   :  { %617 = vst [vmem:[#allocation7 + $0x80] sm:$0xff] %v467_v17  ;;  %619 = vst [vmem:[#allocation7 + $0x90] sm:$0xff] %v510_v18  ;;  %v469_v19 = vpop.f32.mrb[7].mxu0  ;;  %v512_v20 = vpop.f32.mrb[7].mxu1 }
 0x120   :  { %618 = vst [vmem:[#allocation7 + $0x88] sm:$0xff] %v469_v19  ;;  %620 = vst [vmem:[#allocation7 + $0x98] sm:$0xff] %v512_v20 }
 0x12c   :  { %v549_v21 = vpop.f32.mrb[8].mxu0  ;;  %v592_v22 = vpop.f32.mrb[8].mxu1 }
 0x12d   :  { %609 = vst [vmem:[#allocation7 + $0x40] sm:$0xff] %v549_v21  ;;  %611 = vst [vmem:[#allocation7 + $0x50] sm:$0xff] %v592_v22  ;;  %v551_v23 = vpop.f32.mrb[9].mxu0  ;;  %v594_v24 = vpop.f32.mrb[9].mxu1 }
 0x12e   :  { %610 = vst [vmem:[#allocation7 + $0x48] sm:$0xff] %v551_v23  ;;  %612 = vst [vmem:[#allocation7 + $0x58] sm:$0xff] %v594_v24  ;;  %v553_v25 = vpop.f32.mrb[10].mxu0  ;;  %v596_v26 = vpop.f32.mrb[10].mxu1 }
 0x12f   :  { %621 = vst [vmem:[#allocation7 + $0xa0] sm:$0xff] %v553_v25  ;;  %623 = vst [vmem:[#allocation7 + $0xb0] sm:$0xff] %v596_v26  ;;  %v555_v27 = vpop.f32.mrb[11].mxu0  ;;  %v598_v28 = vpop.f32.mrb[11].mxu1 }
 0x130   :  { %622 = vst [vmem:[#allocation7 + $0xa8] sm:$0xff] %v555_v27  ;;  %624 = vst [vmem:[#allocation7 + $0xb8] sm:$0xff] %v598_v28 }
 0x131   :  { %830 = shalt.err (!%p827_p6)
}
 0x132   :  { %s831_s12 = scalar_lea.hbm %s945_s2, 3072 }
 0x133   :  { %p832_p7 = scmp.ne.s32.totalorder %s945_s2, %s831_s12  ;;  %p835_p8 = scmp.lt.u32.totalorder %s831_s12, %s945_s2 }
 0x135   :  { %p837_p9 = pnand %p835_p8, %p832_p7 }
 0x137   :  { %840 = shalt.err (!%p837_p9)
}
 0x138   :  { %s855_s17 = smov 1536   ;;  %s856_s18 = smov 96  }
 0x139   :  { %636 = dma.vmem_to_hbm [thread:$0]  %s631_s8, 3072, %s945_s2, [#allocation4], %s855_s17, %s855_s17, %s856_s18  }
 0x13a   :  { %845 = dma.done.wait [#allocation4], 3072  }
 0x13b   :  { %846 = vsyncadd [#allocation4], 4294964224 }
 0x13c   :  { %640 = vsyncpa [#allocation3], 1 }
 0x13d   :  { %641 = vsyncpa [#allocation6], 1 }
 0x13e   :  { %642 = vsyncpa [#allocation4], 1 }

</bundles_post_ra>
